<compile_context>
chip_gen: v7x
topology: tpu7x:2x2x1
jax: 0.10.0
libtpu: 0.0.40
codegen_flags: <defaults>
</compile_context>

<pallas_src>
import math

import jax
import jax.numpy as jnp
from jax.experimental import pallas as pl
from jax.experimental.pallas import tpu as pltpu


def _glu_kernel(x_ref, o_ref):
    # x_ref block: (1, 2, n_tile) — row 0 = outputs half, row 1 = gate half.
    a = x_ref[:, 0:1, :].astype(jnp.float32)
    g = x_ref[:, 1:2, :].astype(jnp.float32)
    # sigmoid -> EUP, multiply -> VPU; single downcast on the store.
    o_ref[...] = (a * jax.nn.sigmoid(g)).astype(o_ref.dtype)


def _vmem_working_set_budget() -> int:
    """Double-buffered working-set budget, generation-aware (v7x: 64 MiB VMEM)."""
    try:
        cap = pltpu.get_tpu_info().vmem_capacity_bytes
    except Exception:  # conservative fallback if the query is unavailable
        cap = 64 * 1024 * 1024
    return min(8 * 1024 * 1024, cap // 8)


def _choose_tile(pre: int, n: int, itemsize: int) -> int:
    """Pick the lane-dense tile width along the flattened (half*post) axis."""
    # Per grid step we move 2*n_tile input + n_tile output elements, each
    # double-buffered by the Pallas pipeline: working set = 6*n_tile*itemsize.
    budget = _vmem_working_set_budget()
    max_out_elems = max(128, (budget // 6) // itemsize)

    if n <= max_out_elems:
        n_tile = n                                # full extent: always a legal block
    else:
        n_tile = (max_out_elems // 128) * 128     # lane-dense, masked last block

    # Keep >= 8 grid steps when possible so both v7x TensorCores get several
    # steps each and the software pipeline has DMA/compute to overlap.
    def steps(t: int) -> int:
        return pre * (-(-n // t))

    while steps(n_tile) < 8 and n_tile >= 256:
        n_tile = max(128, (n_tile // 2) // 128 * 128)
    return n_tile


def glu(x: jax.Array, dim: int = 1) -> jax.Array:
    """GLU forward: outputs, gate = chunk(x, 2, dim); outputs * sigmoid(gate)."""
    shape = x.shape
    ndim = len(shape)
    if dim < 0:
        dim += ndim
    assert 0 <= dim < ndim, "invalid split dim"
    assert shape[dim] % 2 == 0, "split dim must be even for GLU"

    half = shape[dim] // 2
    pre = int(math.prod(shape[:dim]))
    post = int(math.prod(shape[dim + 1:]))
    n = half * post
    itemsize = jnp.dtype(x.dtype).itemsize

    # Free (contiguous) reshape: the two halves land on a size-2 middle axis.
    x3 = x.reshape(pre, 2, n)

    n_tile = _choose_tile(pre, n, itemsize)
    grid = (pre, pl.cdiv(n, n_tile))

    out3 = pl.pallas_call(
        _glu_kernel,
        out_shape=jax.ShapeDtypeStruct((pre, 1, n), x.dtype),
        grid=grid,
        in_specs=[pl.BlockSpec((1, 2, n_tile), lambda b, t: (b, 0, t))],
        out_specs=pl.BlockSpec((1, 1, n_tile), lambda b, t: (b, 0, t)),
        compiler_params=pltpu.CompilerParams(
            dimension_semantics=("parallel", "parallel"),
        ),
        cost_estimate=pl.CostEstimate(
            flops=4 * pre * n,
            transcendentals=pre * n,
            bytes_accessed=3 * pre * n * itemsize,
        ),
    )(x3)

    out_shape = shape[:dim] + (half,) + shape[dim + 1:]
    return out3.reshape(out_shape)


if __name__ == "__main__":
    key = jax.random.PRNGKey(0)

    def ref_glu(xa, d):
        a, g = jnp.split(xa, 2, axis=d)
        return a * jax.nn.sigmoid(g)

    # (B, 2C, T) with dim=1 — the FastSpeech2 conv-block layout.
    B, C2, T = 2, 16, 128
    x = jax.random.normal(key, (B, C2, T), dtype=jnp.float32)
    y = jax.block_until_ready(glu(x, dim=1))
    assert y.shape == (B, C2 // 2, T)
    assert jnp.allclose(y, ref_glu(x, 1), atol=1e-6, rtol=1e-6)

    # bf16 path (kernel computes in f32, single downcast on the store).
    xb = x.astype(jnp.bfloat16)
    yb = jax.block_until_ready(glu(xb, dim=1))
    yb_ref = ref_glu(xb.astype(jnp.float32), 1).astype(jnp.bfloat16)
    assert jnp.allclose(
        yb.astype(jnp.float32), yb_ref.astype(jnp.float32), atol=1e-2, rtol=1e-2
    )

    # Ragged time extent (not a multiple of 128) — full-extent block path.
    xr = jax.random.normal(jax.random.PRNGKey(1), (2, 6, 50), dtype=jnp.float32)
    yr = jax.block_until_ready(glu(xr, dim=1))
    assert yr.shape == (2, 3, 50)
    assert jnp.allclose(yr, ref_glu(xr, 1), atol=1e-6, rtol=1e-6)

    # Generic dim (last axis) — exercised via the same free-reshape wrapper.
    xd = jax.random.normal(jax.random.PRNGKey(2), (2, 8, 64), dtype=jnp.float32)
    yd = jax.block_until_ready(glu(xd, dim=-1))
    assert yd.shape == (2, 8, 32)
    assert jnp.allclose(yd, ref_glu(xd, -1), atol=1e-6, rtol=1e-6)

    print("KERNEL_OK")
</pallas_src>

<mosaic_0001>
module attributes {stable_mosaic.version = 11 : i64} {
  func.func @_glu_kernel(%arg0: i32, %arg1: i32, %arg2: memref<1x2x256xf32, #tpu.memory_space<vmem>>, %arg3: memref<1x1x256xf32, #tpu.memory_space<vmem>>) attributes {dimension_semantics = [#tpu.dimension_semantics<parallel>, #tpu.dimension_semantics<parallel>], iteration_bounds = array<i64: 2, 4>, scalar_prefetch = 0 : i64, scratch_operands = 0 : i64, tpu.core_type = #tpu.core_type<tc>, window_params = [{transform_indices = @transform_0, window_bounds = array<i64: 1, 2, 256>}, {transform_indices = @transform_1, window_bounds = array<i64: 1, 1, 256>}]} {
    %c0 = arith.constant 0 : index
    %c0_0 = arith.constant 0 : index
    %c0_1 = arith.constant 0 : index
    %0 = vector.load %arg2[%c0, %c0_0, %c0_1] : memref<1x2x256xf32, #tpu.memory_space<vmem>>, vector<1x1x256xf32>
    %c0_2 = arith.constant 0 : index
    %c1 = arith.constant 1 : index
    %c0_3 = arith.constant 0 : index
    %1 = vector.load %arg2[%c0_2, %c1, %c0_3] : memref<1x2x256xf32, #tpu.memory_space<vmem>>, vector<1x1x256xf32>
    %2 = arith.negf %1 : vector<1x1x256xf32>
    %3 = math.exp %2 : vector<1x1x256xf32>
    %cst = arith.constant 1.000000e+00 : f32
    %4 = vector.broadcast %cst : f32 to vector<1x1x256xf32>
    %5 = arith.addf %4, %3 : vector<1x1x256xf32>
    %6 = arith.divf %4, %5 : vector<1x1x256xf32>
    %7 = arith.mulf %0, %6 : vector<1x1x256xf32>
    %c0_4 = arith.constant 0 : index
    %c0_5 = arith.constant 0 : index
    %c0_6 = arith.constant 0 : index
    %8 = vector.load %arg3[%c0_4, %c0_5, %c0_6] : memref<1x1x256xf32, #tpu.memory_space<vmem>>, vector<1x1x256xf32>
    tpu.vector_store %arg3[%c0_4, %c0_5, %c0_6], %7 {strides = array<i32>} : memref<1x1x256xf32, #tpu.memory_space<vmem>>, vector<1x1x256xf32>,
    return
  }
  func.func @transform_0(%arg0: i32, %arg1: i32) -> (i32, i32, i32) {
    %c0_i32 = arith.constant 0 : i32
    %c0_i32_0 = arith.constant 0 : i32
    return %arg0, %c0_i32, %arg1 : i32, i32, i32
  }
  func.func @transform_1(%arg0: i32, %arg1: i32) -> (i32, i32, i32) {
    %c0_i32 = arith.constant 0 : i32
    %c0_i32_0 = arith.constant 0 : i32
    return %arg0, %c0_i32, %arg1 : i32, i32, i32
  }
}

</mosaic_0001>

<bundles_post_ra>
// kernel: tpu_custom_call.1
= control target key start
LH: loop header
LB: loop body
LE: loop exit
PB: predicated region body
PF: predicated region fallthrough
CT: control target
= control target key end

     0   :  { %6 = vsyncpa [#allocation3], 0  ;;  %s710_s0 = inlined_call_operand.hbm [shape: f32[2,2,1024], index: 0, kind: input, shape index: {}]   ;;  %s711_s1 = inlined_call_operand.hbm [shape: f32[2,1,1024], index: 1, kind: output, shape index: {}]  }
   0x1   :  { %8 = vsyncpa [#allocation3 + $0x1], 0 }
   0x2   :  { %9 = vsyncpa [#allocation4], 0 }
   0x3   :  { %11 = vsyncpa [#allocation4 + $0x1], 0  ;;  %s515_s6 = smov 0   ;;  %s517_s7 = smov 0  }
   0x4   :  { %s519_s8 = smov 0   ;;  %s521_s9 = smov 0  }
   0x5   :  { %s523_s10 = smov 0   ;;  %s525_s11 = smov 0  }
   0x6   :  { %s527_s12 = smov 0   ;;  %s529_s13 = smov 0  }
   0x7 LB: > { %s272_s14 = sadd.s32 4294967295, %s501_s13   ;;  %s273_s15 = sadd.s32 4294967294, %s501_s13   ;;  %s501_s13 = sphi %s529_s13, %s17_s13   ;;  %s497_s12 = sphi %s527_s12, %s728_s12   ;;  %s493_s11 = sphi %s525_s11, %s727_s11   ;;  %s489_s10 = sphi %s523_s10, %s726_s10   ;;  %s485_s9 = sphi %s521_s9, %s725_s9   ;;  %s481_s8 = sphi %s519_s8, %s724_s8   ;;  %s477_s7 = sphi %s517_s7, %s723_s7   ;;  %s473_s6 = sphi %s515_s6, %s722_s6  }
   0x8   : > { %s26_s16 = sadd.s32 1, %s493_s11  ;;  %s29_s17 = sadd.s32 1, %s497_s12 }
   0x9   : > { %p27_p0 = scmp.ge.s32.totalorder %s26_s16, 4  ;;  %s38_s18 = sadd.s32 1, %s481_s8 }
   0xa   : > { %p45_p1 = scmp.ne.s32.totalorder %s481_s8, %s477_s7  ;;  %p46_p2 = scmp.eq.s32.totalorder %s501_s13, 0 }
   0xb   : > { %s730_s16 = smov (%p27_p0, %s26_s16), 0  ;;  %s732_s17 = smov (!%p27_p0, %s29_s17), %s497_s12 }
   0xc   : > { %s34_s19 = ssub.s32 %s493_s11, %s730_s16  ;;  %p568_p3 = por %p46_p2, %p45_p1 }
   0xd   : > { %p31_p4 = scmp.ge.s32.totalorder %s732_s17, 2  ;;  %p51_p5 = scmp.ne.s32.totalorder %s477_s7, %s473_s6 }
   0xe   : > { %p52_p6 = scmp.eq.s32.totalorder %s272_s14, 0  ;;  %p77_p7 = scmp.eq.s32.totalorder %s272_s14, 7 }
   0xf   : > { %s734_s17 = smov (%p31_p4, %s732_s17), 0  ;;  %p83_p10 = scmp.eq.s32.totalorder %s273_s15, 7 }
  0x10   : > { %p576_p8 = por %p52_p6, %p51_p5  ;;  %p580_p9 = por %p77_p7, %p45_p1 }
  0x11   : > { %s33_s23 = ssub.s32 %s497_s12, %s734_s17  ;;  %p586_p12 = por %p83_p10, %p51_p5 }
  0x12   : > { %s715_s22 = scalar_select %p580_p9, 1, 0 }
  0x13   : > { %s35_s24 = sor.u32 %s34_s19, %s33_s23  ;;  %p303_p13 = scmp.lt.s32.totalorder %s501_s13, 8 }
  0x14   : > { %p36_p11 = scmp.eq.s32.totalorder %s35_s24, 0  ;;  %s103_s26 = sand.u32 1, %s481_s8  }
  0x15   : > { %s716_s25 = scalar_select %p586_p12, 1, 0 }
  0x16   : > { %s593_s27 = scalar_select %p36_p11, %s481_s8, %s38_s18  }
  0x17   : > { %s276_s28 = sshll.u32 %s103_s26, 2  ;;  %s277_s29 = sshll.u32 %s493_s11, 1 }
  0x18   : > { %s278_s30 = sshll.u32 %s497_s12, 3  ;;  %s107_s2 = scalar_lea.vmem [#allocation2], %s276_s28 }
  0x19   : > { %s117_s3 = sshll.u32 %s107_s2, 4  ;;  %s113_s4 = sadd.s32 %s278_s30, %s277_s29  ;;  %s597_s3 = int_to_ptr.vmem [resolvable:$true] %s117_s3 }
  0x1a   : > { %s279_s5 = sshll.u32 %s113_s4, 5  ;;  %p601_p0 = pnand %p303_p13, %p568_p3 }
  0x1b   : > { %s608_s18 = scalar_lea.hbm %s710_s0, %s279_s5  ;;  %s104_s23 = scalar_lea.sflag [#allocation3], %s103_s26 }
  0x1c   : > { %s373_s24 = scalar_lea.hbm %s608_s18, 64  ;;  %p375_p3 = pneg %p601_p0 }
  0x1d   : > { %p374_p4 = scmp.ne.s32.totalorder %s608_s18, %s373_s24  ;;  %s378_s29 = scalar_lea.hbm %s710_s0, 512 }
  0x1e   : > { %p379_p7 = scmp.lt.u32.totalorder %s608_s18, %s710_s0  ;;  %p380_p10 = scmp.lt.u32.totalorder %s378_s29, %s373_s24 }
  0x1f   : > { %p376_p5 = pnand %p375_p3, %p374_p4  ;;  %p382_p13 = scmp.lt.u32.totalorder %s373_s24, %s608_s18 }
  0x20   : > { %p381_p11 = por %p380_p10, %p379_p7 }
  0x21   : > { %p377_p6 = pneg %p376_p5 }
  0x22   : > { %p383_p1 = por %p382_p13, %p381_p11 }
  0x24   : > { %p384_p2 = pnand %p383_p1, %p377_p6 }
  0x26   : > { %387 = shalt.err (!%p384_p2)
}
  0x27   : > { %s388_s26 = scalar_lea.vmem %s597_s3, 64  ;;  %s503_s4 = smov [#allocation2]  }
  0x28   : > { %p389_p4 = scmp.ne.s32.totalorder %s597_s3, %s388_s26  ;;  %s393_s5 = sshll.u32 %s503_s4, 4  ;;  %s394_s5 = int_to_ptr.vmem [resolvable:$false] %s393_s5 }
  0x29   : > { %s395_s15 = scalar_lea.vmem %s394_s5, 128  ;;  %p396_p9 = scmp.lt.s32.totalorder %s597_s3, %s394_s5 }
  0x2a   : > { %p391_p5 = pnand %p389_p4, %p375_p3  ;;  %p397_p7 = scmp.lt.s32.totalorder %s395_s15, %s388_s26 }
  0x2c   : > { %p392_p12 = pneg %p391_p5  ;;  %p398_p10 = por %p397_p7, %p396_p9 }
  0x2e   : > { %p399_p11 = pnand %p398_p10, %p392_p12 }
  0x30   : > { %402 = shalt.err (!%p399_p11)
}
  0x31   : > { %298 = dma.hbm_to_vmem [thread:$0]  (!%p601_p0), %s608_s18, 64, %s597_s3, %s104_s23  }
  0x32   : > { %p718_p1 = scmp.lt.s32.totalorder %s501_s13, 9  ;;  %p719_p2 = scmp.ge.s32.totalorder %s501_s13, 1 }
  0x34   : > { %p123_p3 = pnand %p719_p2, %p718_p1 }
  0x35   : > { %s642_s19 = sand.u32 (!%p123_p3), 1, %s477_s7  }
  0x36   : > { %126 = sbr.rel (%p123_p3) target bundleno = 105 (0x69), region = 24  ;;  %s281_s24 = sshll.u32 (!%p123_p3), %s642_s19, 2 }
  0x37   : > { %s129_s20 = scalar_lea.sflag (!%p123_p3), [#allocation3], %s642_s19  ;;  %s132_s28 = scalar_lea.vmem (!%p123_p3), [#allocation2], %s281_s24 }
  0x3d   : > { %464 = dma.done.wait (%p576_p8), %s129_s20, 64  }
  0x3e   : > { %466 = vsyncadd (%p576_p8), %s129_s20, 4294967232  ;;  %v283_v0 = vld [vmem:[%s132_s28 + $0x1] ss:$2 sm:$0x3]  ;;  %s282_s3 = sshll.u32 %s642_s19, 1  ;;  %s286_s14 = sshll.u32 %s485_s9, 1  ;;  %v163_v4 = vlaneseq }
  0x3f   : > { %v284_v1 = vmul.f32 -1.442695, %v283_v0  ;;  %s287_s18 = sshll.u32 %s489_s10, 3  ;;  %v153_v5 = vld [vmem:[%s132_s28] ss:$2 sm:$0x3] }
  0x40   : > { %s181_s23 = sadd.s32 %s287_s18, %s286_s14  ;;  %s150_s29 = scalar_lea.vmem [#allocation5], %s282_s3  ;;  %vm165_vm0 = vcmp.lt.s32.totalorder %v163_v4, 256 }
  0x41   : > { %369 = vpow2.f32 %v284_v1  ;;  %s185_s21 = sshll.u32 %s150_s29, 4  ;;  %s288_s30 = sshll.u32 %s181_s23, 4  ;;  %s653_s21 = int_to_ptr.vmem [resolvable:$true] %s185_s21 }
  0x42   : > { %s658_s9 = scalar_lea.hbm %s711_s1, %s288_s30  ;;  %s169_s10 = scalar_lea.sflag [#allocation4], %s642_s19 }
  0x43   : > { %s403_s4 = scalar_lea.vmem %s653_s21, 32  ;;  %p720_p9 = scmp.ne.s32.totalorder %s715_s22, 0 }
  0x44   : > { %p404_p8 = scmp.ne.s32.totalorder %s653_s21, %s403_s4  ;;  %s504_s5 = smov [#allocation5]  }
  0x45   : > { %s407_s15 = sshll.u32 %s504_s5, 4  ;;  %s408_s15 = int_to_ptr.vmem [resolvable:$false] %s407_s15 }
  0x46   : > { %p405_p12 = pnand %p404_p8, %p720_p9  ;;  %s409_s24 = scalar_lea.vmem %s408_s15, 64 }
  0x47   : > { %p410_p6 = scmp.lt.s32.totalorder %s653_s21, %s408_s15  ;;  %p411_p13 = scmp.lt.s32.totalorder %s409_s24, %s403_s4 }
  0x48   : > { %p406_p0 = pneg %p405_p12 }
  0x49   : > { %p412_p4 = por %p411_p13, %p410_p6 }
  0x4b   : > { %v370_v2 = vpop.eup %369  ;;  %p413_p5 = pnand %p412_p4, %p406_p0 }
  0x4c   : > { %v159_v3 = vadd.f32 1.0, %v370_v2 }
  0x4e   : > { %371 = vrcp.f32 %v159_v3 }
  0x58   : > { %v372_v6 = vpop.eup %371 }
  0x59   : > { %v162_v7 = vmul.f32 %v372_v6, %v153_v5 }
  0x5b   : > { %167 = vst.msk [vmem:[%s150_s29] sm:$0x3] %vm165_vm0, %v162_v7 }
  0x5c   : > { %416 = shalt.err (!%p413_p5)
}
  0x5d   : > { %s417_s19 = scalar_lea.hbm %s658_s9, 32  ;;  %s421_s3 = scalar_lea.hbm %s711_s1, 256 }
  0x5e   : > { %p418_p7 = scmp.ne.s32.totalorder %s658_s9, %s417_s19  ;;  %p422_p1 = scmp.lt.u32.totalorder %s658_s9, %s711_s1 }
  0x5f   : > { %p423_p2 = scmp.lt.u32.totalorder %s421_s3, %s417_s19  ;;  %p425_p8 = scmp.lt.u32.totalorder %s417_s19, %s658_s9 }
  0x60   : > { %p419_p10 = pnand %p418_p7, %p720_p9 }
  0x61   : > { %p424_p3 = por %p423_p2, %p422_p1 }
  0x62   : > { %p420_p11 = pneg %p419_p10 }
  0x63   : > { %p426_p12 = por %p425_p8, %p424_p3 }
  0x65   : > { %p427_p0 = pnand %p426_p12, %p420_p11 }
  0x67   : > { %430 = shalt.err (!%p427_p0)
}
  0x68   : > { %293 = dma.vmem_to_hbm [thread:$0]  (%p720_p9), %s653_s21, 32, %s658_s9, %s169_s10  }
  0x69 PF: > { %p304_p6 = scmp.ge.s32.totalorder %s501_s13, 2  ;;  %s197_s23 = sand.u32 1, %s473_s6  }
  0x6a   : > { %p721_p13 = scmp.ne.s32.totalorder %s716_s25, 0  ;;  %s198_s29 = scalar_lea.sflag [#allocation4], %s197_s23 }
  0x6c   : > { %p300_p4 = pnand %p304_p6, %p721_p13 }
  0x6e   : > { %468 = dma.done.wait (!%p300_p4), %s198_s29, 32  }
  0x6f   : > { %470 = vsyncadd (!%p300_p4), %s198_s29, 4294967264  ;;  %s17_s13 = sadd.s32 1, %s501_s13   ;;  %s722_s6 = smov %s477_s7 }
  0x70   : > { %p14_p5 = scmp.ge.s32.totalorder %s17_s13, 10   ;;  %s723_s7 = smov %s481_s8 }
  0x71   : > { %s724_s8 = smov %s593_s27  ;;  %s725_s9 = smov %s493_s11 }
  0x72   : > { %s726_s10 = smov %s497_s12  ;;  %s727_s11 = smov %s730_s16 }
  0x73   : > { %s728_s12 = smov %s734_s17  ;;  %16 = sbr.rel (!%p14_p5) target bundleno = 7 (0x7), region = 70 }
  0x7a   :  { %203 = vsyncpa [#allocation3], 1 }
  0x7b   :  { %205 = vsyncpa [#allocation3 + $0x1], 1 }
  0x7c   :  { %206 = vsyncpa [#allocation4], 1 }
  0x7d   :  { %208 = vsyncpa [#allocation4 + $0x1], 1 }

</bundles_post_ra>
